<compile_context>
chip_gen: v7x
topology: tpu7x:2x2x1
jax: 0.10.0
libtpu: 0.0.40
codegen_flags: <defaults>
</compile_context>

<pallas_src>
import functools
import math

import jax
import jax.numpy as jnp
from jax.experimental import pallas as pl
from jax.experimental.pallas import tpu as pltpu


def _gelu_tanh(x):
    # TODO(synk): PyTorch nn.GELU() default is the exact erf-GELU; erf lowering is
    # not guaranteed in Mosaic, so the tanh approximation is used (deviation ~3e-4).
    c = 0.7978845608028654  # sqrt(2/pi)
    return 0.5 * x * (1.0 + jnp.tanh(c * (x + 0.044715 * x * x * x)))


def mbconv_kernel(x_ref, w1_ref, b1_ref, mw_ref, dwb_ref,
                  wr_ref, br_ref, we_ref, be_ref, w2_ref, b2_ref, o_ref, *, W):
    """One grid step: a batch block of Bb images, fully vectorised over the batch."""
    x = x_ref[...]                                    # (Bb, C, HW) f32
    Bb, C, HW = x.shape
    w1 = w1_ref[...]                                  # (Cm, C)  BN0/BN1-folded
    Cm = w1.shape[0]

    # --- 1x1 expansion conv on the MXU: per-image (Cm,C)@(C,HW) batched matmul.
    w1b = jnp.broadcast_to(w1[None], (Bb, Cm, C))     # tiny, hoisted once per block
    h = jnp.einsum("bmc,bcp->bmp", w1b, x, preferred_element_type=jnp.float32)
    h = h + b1_ref[...][None]                         # (1, Cm, 1) broadcast

    # --- depthwise 3x3, padding=1 (BN2 folded).  Each tap is a lane roll of the
    # flattened spatial axis (rolls wrap within each image's own HW row) times the
    # mask-fused weight MW[tap] = border_mask * folded_dw_weight.
    mw = mw_ref[...]                                  # (9, Cm, HW)
    acc = mw[4][None] * h                             # center tap (mask == 1)
    # 2-D view for the roll: (Bb*Cm, HW) is layout-identical to (Bb, Cm, HW)
    # (Cm is a multiple of 8 sublanes, HW a multiple of 128 lanes).
    h2 = h.reshape(Bb * Cm, HW)
    for tap in range(9):
        ky, kx = tap // 3, tap % 3
        off = (ky - 1) * W + (kx - 1)
        if off == 0:
            continue                                  # center tap handled above
        # out[..., i] = h[..., i + off]; out-of-image taps are zeroed by MW.
        s = pltpu.roll(h2, shift=(-off) % HW, axis=1).reshape(Bb, Cm, HW)
        acc = acc + mw[tap][None] * s
    acc = acc + dwb_ref[...][None]                    # (1, Cm, 1) broadcast

    # --- SqueezeExcite: per-image global average pool -> reduce -> GELU ->
    # expand -> sigmoid gate (pool is a per-row lane reduction, no cross-image mix).
    pooled = jnp.mean(acc, axis=2)                                          # (Bb, Cm)
    r = jnp.dot(pooled, wr_ref[...], preferred_element_type=jnp.float32) + br_ref[...]
    r = _gelu_tanh(r)                                                       # (Bb, rd)
    g = jnp.dot(r, we_ref[...], preferred_element_type=jnp.float32) + be_ref[...]
    se = acc * jax.nn.sigmoid(g)[:, :, None]                                # (Bb, Cm, HW)

    # --- 1x1 projection conv back to C channels on the MXU, then residual add.
    # TODO(synk): the C=4 in/out tiles fill only 4 of 8 sublanes; packing two
    # images' channels per 8-sublane group would densify this load/store path.
    w2 = w2_ref[...]                                  # (C, Cm)
    w2b = jnp.broadcast_to(w2[None], (Bb, C, Cm))
    out = jnp.einsum("bcm,bmp->bcp", w2b, se, preferred_element_type=jnp.float32)
    out = out + b2_ref[...][None]                     # (1, C, 1) broadcast

    # residual (StochasticDepth with drop_path=0.0 is Identity)
    o_ref[...] = x + out


def _pick_image_block(N, C, Cm, HW):
    """Images per grid step.

    Budget ~24 MiB of f32 live tensors per step (~6 (Bb,Cm,HW) intermediates plus
    the double-buffered sublane-padded in/out tiles) so the kernel fits v7x's
    64 MiB VMEM with headroom (v5e/v6e have 128 MiB), cap at 128 images
    (~0.5 MiB of input per step, enough to amortise per-step overhead), and keep
    >= 2 grid steps so the "parallel" batch axis can shard across v7x's 2 TCs.
    """
    per_image = 6 * Cm * HW * 4 + 4 * max(C, 8) * HW * 4
    cap = max(1, min(128, (24 << 20) // per_image))
    if N <= 1:
        return 1
    return max(1, min(cap, (N + 1) // 2))


def _fold_params(params, H, W):
    """Fold the three BatchNorm affines into the adjacent conv weights/biases,
    pre-fuse the depthwise weights with the 0/1 border masks, and reshape into the
    kernel layouts.  Done once at parameter-prep time, outside the kernel."""
    s0, b0 = params["s0"][0], params["b0"][0]        # (C,)
    s1, bb1 = params["s1"][0], params["bb1"][0]      # (Cm,)
    s2, bb2 = params["s2"][0], params["bb2"][0]      # (Cm,)
    w1, b1 = params["w1"], params["b1"][0]           # (C, Cm), (Cm,)
    dww, dwb = params["dww"], params["dwb"][0]       # (9, Cm), (Cm,)

    W1f = (w1.T * s0[None, :]) * s1[:, None]         # (Cm, C)
    B1f = (s1 * (b0 @ w1 + b1) + bb1)[:, None]       # (Cm, 1)
    dw_folded = dww * s2[None, :]                    # (9, Cm)
    DWB = (s2 * dwb + bb2)[:, None]                  # (Cm, 1)

    # 0/1 border masks for the 9 flat-rolled stencil taps, pre-fused with the
    # BN2-folded depthwise weights: MW[tap] = mask[tap] (per pixel) * w[tap] (per ch).
    yy, xx = jnp.meshgrid(jnp.arange(H), jnp.arange(W), indexing="ij")
    mlist = []
    for ky in range(3):
        for kx in range(3):
            dy, dx = ky - 1, kx - 1
            ok = (yy + dy >= 0) & (yy + dy < H) & (xx + dx >= 0) & (xx + dx < W)
            mlist.append(ok.reshape(H * W).astype(jnp.float32))
    masks = jnp.stack(mlist, axis=0)                 # (9, HW)
    MW = dw_folded[:, :, None] * masks[:, None, :]   # (9, Cm, HW) ~ 144 KiB

    # NOTE: the remaining constants are tiny; they stay as separate operands with
    # constant index maps (resident across grid steps).  Packing them into one
    # array would only shave step-0 DMA bookkeeping.
    return [
        W1f, B1f, MW, DWB,
        params["wr"],                # (Cm, rd)
        params["br"],                # (1, rd)
        params["we"],                # (rd, Cm)
        params["be"],                # (1, Cm)
        params["w2"].T,              # (C, Cm)
        params["b2"][0][:, None],    # (C, 1)
    ]


def _const_spec(shape):
    zeros = (0,) * len(shape)
    return pl.BlockSpec(shape, lambda n, _z=zeros: _z)


def mbconv_forward(x_nchw, params):
    N, C, H, W = x_nchw.shape
    HW = H * W

    weights = _fold_params(params, H, W)
    Cm = weights[0].shape[0]

    # NCHW kept; merging H,W into one lane-dense axis is a free reshape.
    x3 = x_nchw.reshape(N, C, HW).astype(jnp.float32)
    # TODO(synk): for HBM-bandwidth-bound deployments (v5e/v6e) store x3/out as
    # bf16 in HBM and cast to f32 after load; kept f32 to match module dtypes.

    Bb = _pick_image_block(N, C, Cm, HW)
    Npad = ((N + Bb - 1) // Bb) * Bb
    if Npad != N:                                    # non-divisor batch: pad, not Bb=1
        x3 = jnp.pad(x3, ((0, Npad - N), (0, 0), (0, 0)))
    grid = (Npad // Bb,)

    in_specs = [pl.BlockSpec((Bb, C, HW), lambda n: (n, 0, 0))]
    in_specs += [_const_spec(w.shape) for w in weights]

    out3 = pl.pallas_call(
        functools.partial(mbconv_kernel, W=W),
        out_shape=jax.ShapeDtypeStruct((Npad, C, HW), jnp.float32),
        grid_spec=pltpu.PrefetchScalarGridSpec(
            num_scalar_prefetch=0,
            grid=grid,
            in_specs=in_specs,
            out_specs=pl.BlockSpec((Bb, C, HW), lambda n: (n, 0, 0)),
        ),
        compiler_params=pltpu.CompilerParams(
            dimension_semantics=("parallel",),
            # Explicit budget: block sizing keeps the step footprint well under
            # this on v7x (64 MiB physical); v5e/v6e have 128 MiB.
            vmem_limit_bytes=48 * 1024 * 1024,
        ),
    )(x3, *weights)

    if Npad != N:
        out3 = out3[:N]
    return out3.reshape(N, C, H, W)


def mbconv_reference(x, p):
    """Pure-JAX NCHW reference of the same forward (unfolded params)."""
    N, C, H, W = x.shape

    def aff(t, s, b):
        return t * s[0][None, :, None, None] + b[0][None, :, None, None]

    y = aff(x, p["s0"], p["b0"])
    h = jnp.einsum("nchw,cd->ndhw", y, p["w1"]) + p["b1"][0][None, :, None, None]
    h = aff(h, p["s1"], p["bb1"])
    hp = jnp.pad(h, ((0, 0), (0, 0), (1, 1), (1, 1)))
    acc = jnp.zeros_like(h)
    for ky in range(3):
        for kx in range(3):
            acc = acc + hp[:, :, ky:ky + H, kx:kx + W] * \
                p["dww"][ky * 3 + kx][None, :, None, None]
    acc = acc + p["dwb"][0][None, :, None, None]
    acc = aff(acc, p["s2"], p["bb2"])
    pooled = acc.mean(axis=(2, 3))                                  # (N, Cm)
    r = _gelu_tanh(pooled @ p["wr"] + p["br"][0])
    gate = jax.nn.sigmoid(r @ p["we"] + p["be"][0])
    se = acc * gate[:, :, None, None]
    out = jnp.einsum("ndhw,dc->nchw", se, p["w2"]) + p["b2"][0][None, :, None, None]
    return x + out


def init_params(key, in_channels, expansion_rate=4, se_ratio=0.25, eps=1e-5):
    C = in_channels
    Cm = C * expansion_rate
    rd = max(1, int(round(Cm * se_ratio)))
    keys = jax.random.split(key, 24)
    ki = iter(keys)

    def bn_affine(c):
        gamma = jax.random.uniform(next(ki), (1, c), jnp.float32, 0.5, 1.5)
        beta = 0.1 * jax.random.normal(next(ki), (1, c), jnp.float32)
        mean = 0.1 * jax.random.normal(next(ki), (1, c), jnp.float32)
        var = jax.random.uniform(next(ki), (1, c), jnp.float32, 0.5, 1.5)
        scale = gamma / jnp.sqrt(var + eps)
        bias = beta - mean * scale
        return scale, bias

    s0, b0 = bn_affine(C)
    s1, bb1 = bn_affine(Cm)
    s2, bb2 = bn_affine(Cm)

    return {
        "s0": s0, "b0": b0,
        "w1": jax.random.normal(next(ki), (C, Cm), jnp.float32) / math.sqrt(C),
        "b1": 0.1 * jax.random.normal(next(ki), (1, Cm), jnp.float32),
        "s1": s1, "bb1": bb1,
        "dww": jax.random.normal(next(ki), (9, Cm), jnp.float32) / 3.0,
        "dwb": 0.1 * jax.random.normal(next(ki), (1, Cm), jnp.float32),
        "s2": s2, "bb2": bb2,
        "wr": jax.random.normal(next(ki), (Cm, rd), jnp.float32) / math.sqrt(Cm),
        "br": 0.1 * jax.random.normal(next(ki), (1, rd), jnp.float32),
        "we": jax.random.normal(next(ki), (rd, Cm), jnp.float32) / math.sqrt(rd),
        "be": 0.1 * jax.random.normal(next(ki), (1, Cm), jnp.float32),
        "w2": jax.random.normal(next(ki), (Cm, C), jnp.float32) / math.sqrt(Cm),
        "b2": 0.1 * jax.random.normal(next(ki), (1, C), jnp.float32),
    }


if __name__ == "__main__":
    # Small shapes consistent with the module: in_channels=4, expansion_rate=4.
    C, H, W = 4, 16, 16
    key = jax.random.PRNGKey(0)
    k_x, k_p, k_x2 = jax.random.split(key, 3)
    params = init_params(k_p, in_channels=C, expansion_rate=4, se_ratio=0.25)

    # Primary check: batch 2 (matches the suggested demo shape).
    x = jax.random.normal(k_x, (2, C, H, W), jnp.float32)   # NCHW, like PyTorch
    out = jax.block_until_ready(mbconv_forward(x, params))
    ref = mbconv_reference(x, params)
    assert out.shape == x.shape, out.shape
    assert bool(jnp.all(jnp.isfinite(out)))
    assert bool(jnp.allclose(out, ref, atol=1e-2, rtol=1e-2)), float(
        jnp.max(jnp.abs(out - ref)))

    # Secondary check: non-divisor batch (exercises the zero-padding path and a
    # batch-vectorised block with Bb > 1).
    x2 = jax.random.normal(k_x2, (5, C, H, W), jnp.float32)
    out2 = jax.block_until_ready(mbconv_forward(x2, params))
    ref2 = mbconv_reference(x2, params)
    assert out2.shape == x2.shape, out2.shape
    assert bool(jnp.allclose(out2, ref2, atol=1e-2, rtol=1e-2)), float(
        jnp.max(jnp.abs(out2 - ref2)))

    print("KERNEL_OK")
</pallas_src>

<mosaic_0001>
module attributes {stable_mosaic.version = 11 : i64} {
  func.func @mbconv_kernel(%arg0: i32, %arg1: memref<1x4x256xf32, #tpu.memory_space<vmem>>, %arg2: memref<16x4xf32, #tpu.memory_space<vmem>>, %arg3: memref<16x1xf32, #tpu.memory_space<vmem>>, %arg4: memref<9x16x256xf32, #tpu.memory_space<vmem>>, %arg5: memref<16x1xf32, #tpu.memory_space<vmem>>, %arg6: memref<16x4xf32, #tpu.memory_space<vmem>>, %arg7: memref<1x4xf32, #tpu.memory_space<vmem>>, %arg8: memref<4x16xf32, #tpu.memory_space<vmem>>, %arg9: memref<1x16xf32, #tpu.memory_space<vmem>>, %arg10: memref<4x16xf32, #tpu.memory_space<vmem>>, %arg11: memref<4x1xf32, #tpu.memory_space<vmem>>, %arg12: memref<1x4x256xf32, #tpu.memory_space<vmem>>) attributes {dimension_semantics = [#tpu.dimension_semantics<parallel>], iteration_bounds = array<i64: 2>, scalar_prefetch = 0 : i64, scratch_operands = 0 : i64, tpu.core_type = #tpu.core_type<tc>, window_params = [{transform_indices = @transform_0, window_bounds = array<i64: 1, 4, 256>}, {pipeline_mode = #tpu.pipeline_mode<synchronous>, transform_indices = @transform_1, window_bounds = array<i64: 16, 4>}, {pipeline_mode = #tpu.pipeline_mode<synchronous>, transform_indices = @transform_2, window_bounds = array<i64: 16, 1>}, {pipeline_mode = #tpu.pipeline_mode<synchronous>, transform_indices = @transform_3, window_bounds = array<i64: 9, 16, 256>}, {pipeline_mode = #tpu.pipeline_mode<synchronous>, transform_indices = @transform_4, window_bounds = array<i64: 16, 1>}, {pipeline_mode = #tpu.pipeline_mode<synchronous>, transform_indices = @transform_5, window_bounds = array<i64: 16, 4>}, {pipeline_mode = #tpu.pipeline_mode<synchronous>, transform_indices = @transform_6, window_bounds = array<i64: 1, 4>}, {pipeline_mode = #tpu.pipeline_mode<synchronous>, transform_indices = @transform_7, window_bounds = array<i64: 4, 16>}, {pipeline_mode = #tpu.pipeline_mode<synchronous>, transform_indices = @transform_8, window_bounds = array<i64: 1, 16>}, {pipeline_mode = #tpu.pipeline_mode<synchronous>, transform_indices = @transform_9, window_bounds = array<i64: 4, 16>}, {pipeline_mode = #tpu.pipeline_mode<synchronous>, transform_indices = @transform_10, window_bounds = array<i64: 4, 1>}, {transform_indices = @transform_11, window_bounds = array<i64: 1, 4, 256>}]} {
    %c0 = arith.constant 0 : index
    %c0_0 = arith.constant 0 : index
    %c0_1 = arith.constant 0 : index
    %0 = vector.load %arg1[%c0, %c0_0, %c0_1] : memref<1x4x256xf32, #tpu.memory_space<vmem>>, vector<1x4x256xf32>
    %c0_2 = arith.constant 0 : index
    %c0_3 = arith.constant 0 : index
    %1 = vector.load %arg2[%c0_2, %c0_3] : memref<16x4xf32, #tpu.memory_space<vmem>>, vector<16x4xf32>
    %2 = vector.shape_cast %1 : vector<16x4xf32> to vector<1x16x4xf32>
    "tpu.trace_start"() <{level = 10 : i32, message = "bmc,bcp->bmp"}> : () -> ()
    %cst = arith.constant dense<0.000000e+00> : vector<1x16x256xf32>
    %3 = tpu.matmul %2, %0, %cst {dimension_numbers = #tpu.dot_dimension_numbers<[2], [1], [1], [2], [0, 0, 0, 1, 1, 2], [0], [0]>} : vector<1x16x4xf32>, vector<1x4x256xf32>, vector<1x16x256xf32> -> vector<1x16x256xf32>
    "tpu.trace_stop"() : () -> ()
    %c0_4 = arith.constant 0 : index
    %c0_5 = arith.constant 0 : index
    %4 = vector.load %arg3[%c0_4, %c0_5] : memref<16x1xf32, #tpu.memory_space<vmem>>, vector<16x1xf32>
    %5 = vector.shape_cast %4 : vector<16x1xf32> to vector<1x16x1xf32>
    %6 = vector.broadcast %5 : vector<1x16x1xf32> to vector<1x16x256xf32>
    %7 = arith.addf %3, %6 : vector<1x16x256xf32>
    %c0_6 = arith.constant 0 : index
    %c0_7 = arith.constant 0 : index
    %c0_8 = arith.constant 0 : index
    %8 = vector.load %arg4[%c0_6, %c0_7, %c0_8] : memref<9x16x256xf32, #tpu.memory_space<vmem>>, vector<9x16x256xf32>
    %9 = vector.extract_strided_slice %8 {offsets = [4, 0, 0], sizes = [1, 16, 256], strides = [1, 1, 1]} : vector<9x16x256xf32> to vector<1x16x256xf32>
    %10 = vector.shape_cast %9 : vector<1x16x256xf32> to vector<16x256xf32>
    %11 = vector.shape_cast %10 : vector<16x256xf32> to vector<1x16x256xf32>
    %12 = arith.mulf %11, %7 : vector<1x16x256xf32>
    %13 = vector.shape_cast %7 : vector<1x16x256xf32> to vector<16x256xf32>
    %c17_i32 = arith.constant 17 : i32
    %14 = tpu.dynamic_rotate %13 by %c17_i32 dim 1 : vector<16x256xf32>, i32 -> vector<16x256xf32>
    %15 = vector.shape_cast %14 : vector<16x256xf32> to vector<1x16x256xf32>
    %16 = vector.extract_strided_slice %8 {offsets = [0, 0, 0], sizes = [1, 16, 256], strides = [1, 1, 1]} : vector<9x16x256xf32> to vector<1x16x256xf32>
    %17 = vector.shape_cast %16 : vector<1x16x256xf32> to vector<16x256xf32>
    %18 = vector.shape_cast %17 : vector<16x256xf32> to vector<1x16x256xf32>
    %19 = arith.mulf %18, %15 : vector<1x16x256xf32>
    %20 = arith.addf %12, %19 : vector<1x16x256xf32>
    %c16_i32 = arith.constant 16 : i32
    %21 = tpu.dynamic_rotate %13 by %c16_i32 dim 1 : vector<16x256xf32>, i32 -> vector<16x256xf32>
    %22 = vector.shape_cast %21 : vector<16x256xf32> to vector<1x16x256xf32>
    %23 = vector.extract_strided_slice %8 {offsets = [1, 0, 0], sizes = [1, 16, 256], strides = [1, 1, 1]} : vector<9x16x256xf32> to vector<1x16x256xf32>
    %24 = vector.shape_cast %23 : vector<1x16x256xf32> to vector<16x256xf32>
    %25 = vector.shape_cast %24 : vector<16x256xf32> to vector<1x16x256xf32>
    %26 = arith.mulf %25, %22 : vector<1x16x256xf32>
    %27 = arith.addf %20, %26 : vector<1x16x256xf32>
    %c15_i32 = arith.constant 15 : i32
    %28 = tpu.dynamic_rotate %13 by %c15_i32 dim 1 : vector<16x256xf32>, i32 -> vector<16x256xf32>
    %29 = vector.shape_cast %28 : vector<16x256xf32> to vector<1x16x256xf32>
    %30 = vector.extract_strided_slice %8 {offsets = [2, 0, 0], sizes = [1, 16, 256], strides = [1, 1, 1]} : vector<9x16x256xf32> to vector<1x16x256xf32>
    %31 = vector.shape_cast %30 : vector<1x16x256xf32> to vector<16x256xf32>
    %32 = vector.shape_cast %31 : vector<16x256xf32> to vector<1x16x256xf32>
    %33 = arith.mulf %32, %29 : vector<1x16x256xf32>
    %34 = arith.addf %27, %33 : vector<1x16x256xf32>
    %c1_i32 = arith.constant 1 : i32
    %35 = tpu.dynamic_rotate %13 by %c1_i32 dim 1 : vector<16x256xf32>, i32 -> vector<16x256xf32>
    %36 = vector.shape_cast %35 : vector<16x256xf32> to vector<1x16x256xf32>
    %37 = vector.extract_strided_slice %8 {offsets = [3, 0, 0], sizes = [1, 16, 256], strides = [1, 1, 1]} : vector<9x16x256xf32> to vector<1x16x256xf32>
    %38 = vector.shape_cast %37 : vector<1x16x256xf32> to vector<16x256xf32>
    %39 = vector.shape_cast %38 : vector<16x256xf32> to vector<1x16x256xf32>
    %40 = arith.mulf %39, %36 : vector<1x16x256xf32>
    %41 = arith.addf %34, %40 : vector<1x16x256xf32>
    %c255_i32 = arith.constant 255 : i32
    %42 = tpu.dynamic_rotate %13 by %c255_i32 dim 1 : vector<16x256xf32>, i32 -> vector<16x256xf32>
    %43 = vector.shape_cast %42 : vector<16x256xf32> to vector<1x16x256xf32>
    %44 = vector.extract_strided_slice %8 {offsets = [5, 0, 0], sizes = [1, 16, 256], strides = [1, 1, 1]} : vector<9x16x256xf32> to vector<1x16x256xf32>
    %45 = vector.shape_cast %44 : vector<1x16x256xf32> to vector<16x256xf32>
    %46 = vector.shape_cast %45 : vector<16x256xf32> to vector<1x16x256xf32>
    %47 = arith.mulf %46, %43 : vector<1x16x256xf32>
    %48 = arith.addf %41, %47 : vector<1x16x256xf32>
    %c241_i32 = arith.constant 241 : i32
    %49 = tpu.dynamic_rotate %13 by %c241_i32 dim 1 : vector<16x256xf32>, i32 -> vector<16x256xf32>
    %50 = vector.shape_cast %49 : vector<16x256xf32> to vector<1x16x256xf32>
    %51 = vector.extract_strided_slice %8 {offsets = [6, 0, 0], sizes = [1, 16, 256], strides = [1, 1, 1]} : vector<9x16x256xf32> to vector<1x16x256xf32>
    %52 = vector.shape_cast %51 : vector<1x16x256xf32> to vector<16x256xf32>
    %53 = vector.shape_cast %52 : vector<16x256xf32> to vector<1x16x256xf32>
    %54 = arith.mulf %53, %50 : vector<1x16x256xf32>
    %55 = arith.addf %48, %54 : vector<1x16x256xf32>
    %c240_i32 = arith.constant 240 : i32
    %56 = tpu.dynamic_rotate %13 by %c240_i32 dim 1 : vector<16x256xf32>, i32 -> vector<16x256xf32>
    %57 = vector.shape_cast %56 : vector<16x256xf32> to vector<1x16x256xf32>
    %58 = vector.extract_strided_slice %8 {offsets = [7, 0, 0], sizes = [1, 16, 256], strides = [1, 1, 1]} : vector<9x16x256xf32> to vector<1x16x256xf32>
    %59 = vector.shape_cast %58 : vector<1x16x256xf32> to vector<16x256xf32>
    %60 = vector.shape_cast %59 : vector<16x256xf32> to vector<1x16x256xf32>
    %61 = arith.mulf %60, %57 : vector<1x16x256xf32>
    %62 = arith.addf %55, %61 : vector<1x16x256xf32>
    %c239_i32 = arith.constant 239 : i32
    %63 = tpu.dynamic_rotate %13 by %c239_i32 dim 1 : vector<16x256xf32>, i32 -> vector<16x256xf32>
    %64 = vector.shape_cast %63 : vector<16x256xf32> to vector<1x16x256xf32>
    %65 = vector.extract_strided_slice %8 {offsets = [8, 0, 0], sizes = [1, 16, 256], strides = [1, 1, 1]} : vector<9x16x256xf32> to vector<1x16x256xf32>
    %66 = vector.shape_cast %65 : vector<1x16x256xf32> to vector<16x256xf32>
    %67 = vector.shape_cast %66 : vector<16x256xf32> to vector<1x16x256xf32>
    %68 = arith.mulf %67, %64 : vector<1x16x256xf32>
    %69 = arith.addf %62, %68 : vector<1x16x256xf32>
    %c0_9 = arith.constant 0 : index
    %c0_10 = arith.constant 0 : index
    %70 = vector.load %arg5[%c0_9, %c0_10] : memref<16x1xf32, #tpu.memory_space<vmem>>, vector<16x1xf32>
    %71 = vector.shape_cast %70 : vector<16x1xf32> to vector<1x16x1xf32>
    %72 = vector.broadcast %71 : vector<1x16x1xf32> to vector<1x16x256xf32>
    %73 = arith.addf %69, %72 : vector<1x16x256xf32>
    %cst_11 = arith.constant dense<0.000000e+00> : vector<1x16xf32>
    %74 = vector.multi_reduction <add>, %73, %cst_11 [2] : vector<1x16x256xf32> to vector<1x16xf32>
    %cst_12 = arith.constant 2.560000e+02 : f32
    %75 = vector.broadcast %cst_12 : f32 to vector<1x16xf32>
    %76 = arith.divf %74, %75 : vector<1x16xf32>
    %c0_13 = arith.constant 0 : index
    %c0_14 = arith.constant 0 : index
    %77 = vector.load %arg6[%c0_13, %c0_14] : memref<16x4xf32, #tpu.memory_space<vmem>>, vector<16x4xf32>
    %cst_15 = arith.constant dense<0.000000e+00> : vector<1x4xf32>
    %78 = tpu.matmul %76, %77, %cst_15 {dimension_numbers = #tpu.dot_dimension_numbers<[1], [0], [0], [1], [0, 0, 1, 1], [], []>} : vector<1x16xf32>, vector<16x4xf32>, vector<1x4xf32> -> vector<1x4xf32>
    %c0_16 = arith.constant 0 : index
    %c0_17 = arith.constant 0 : index
    %79 = vector.load %arg7[%c0_16, %c0_17] : memref<1x4xf32, #tpu.memory_space<vmem>>, vector<1x4xf32>
    %80 = arith.addf %78, %79 : vector<1x4xf32>
    %cst_18 = arith.constant 5.000000e-01 : f32
    %81 = vector.broadcast %cst_18 : f32 to vector<1x4xf32>
    %82 = arith.mulf %81, %80 : vector<1x4xf32>
    %cst_19 = arith.constant 4.471500e-02 : f32
    %83 = vector.broadcast %cst_19 : f32 to vector<1x4xf32>
    %84 = arith.mulf %83, %80 : vector<1x4xf32>
    %85 = arith.mulf %84, %80 : vector<1x4xf32>
    %86 = arith.mulf %85, %80 : vector<1x4xf32>
    %87 = arith.addf %80, %86 : vector<1x4xf32>
    %cst_20 = arith.constant 0.797884583 : f32
    %88 = vector.broadcast %cst_20 : f32 to vector<1x4xf32>
    %89 = arith.mulf %88, %87 : vector<1x4xf32>
    %90 = math.tanh %89 : vector<1x4xf32>
    %cst_21 = arith.constant 1.000000e+00 : f32
    %91 = vector.broadcast %cst_21 : f32 to vector<1x4xf32>
    %92 = arith.addf %91, %90 : vector<1x4xf32>
    %93 = arith.mulf %82, %92 : vector<1x4xf32>
    %c0_22 = arith.constant 0 : index
    %c0_23 = arith.constant 0 : index
    %94 = vector.load %arg8[%c0_22, %c0_23] : memref<4x16xf32, #tpu.memory_space<vmem>>, vector<4x16xf32>
    %cst_24 = arith.constant dense<0.000000e+00> : vector<1x16xf32>
    %95 = tpu.matmul %93, %94, %cst_24 {dimension_numbers = #tpu.dot_dimension_numbers<[1], [0], [0], [1], [0, 0, 1, 1], [], []>} : vector<1x4xf32>, vector<4x16xf32>, vector<1x16xf32> -> vector<1x16xf32>
    %c0_25 = arith.constant 0 : index
    %c0_26 = arith.constant 0 : index
    %96 = vector.load %arg9[%c0_25, %c0_26] : memref<1x16xf32, #tpu.memory_space<vmem>>, vector<1x16xf32>
    %97 = arith.addf %95, %96 : vector<1x16xf32>
    %98 = arith.negf %97 : vector<1x16xf32>
    %99 = math.exp %98 : vector<1x16xf32>
    %cst_27 = arith.constant 1.000000e+00 : f32
    %100 = vector.broadcast %cst_27 : f32 to vector<1x16xf32>
    %101 = arith.addf %100, %99 : vector<1x16xf32>
    %102 = arith.divf %100, %101 : vector<1x16xf32>
    %103 = vector.shape_cast %102 : vector<1x16xf32> to vector<1x16x1xf32>
    %104 = vector.broadcast %103 : vector<1x16x1xf32> to vector<1x16x256xf32>
    %105 = arith.mulf %73, %104 : vector<1x16x256xf32>
    %c0_28 = arith.constant 0 : index
    %c0_29 = arith.constant 0 : index
    %106 = vector.load %arg10[%c0_28, %c0_29] : memref<4x16xf32, #tpu.memory_space<vmem>>, vector<4x16xf32>
    %107 = vector.shape_cast %106 : vector<4x16xf32> to vector<1x4x16xf32>
    "tpu.trace_start"() <{level = 10 : i32, message = "bcm,bmp->bcp"}> : () -> ()
    %cst_30 = arith.constant dense<0.000000e+00> : vector<1x4x256xf32>
    %108 = tpu.matmul %107, %105, %cst_30 {dimension_numbers = #tpu.dot_dimension_numbers<[2], [1], [1], [2], [0, 0, 0, 1, 1, 2], [0], [0]>} : vector<1x4x16xf32>, vector<1x16x256xf32>, vector<1x4x256xf32> -> vector<1x4x256xf32>
    "tpu.trace_stop"() : () -> ()
    %c0_31 = arith.constant 0 : index
    %c0_32 = arith.constant 0 : index
    %109 = vector.load %arg11[%c0_31, %c0_32] : memref<4x1xf32, #tpu.memory_space<vmem>>, vector<4x1xf32>
    %110 = vector.shape_cast %109 : vector<4x1xf32> to vector<1x4x1xf32>
    %111 = vector.broadcast %110 : vector<1x4x1xf32> to vector<1x4x256xf32>
    %112 = arith.addf %108, %111 : vector<1x4x256xf32>
    %113 = arith.addf %0, %112 : vector<1x4x256xf32>
    %c0_33 = arith.constant 0 : index
    %c0_34 = arith.constant 0 : index
    %c0_35 = arith.constant 0 : index
    %114 = vector.load %arg12[%c0_33, %c0_34, %c0_35] : memref<1x4x256xf32, #tpu.memory_space<vmem>>, vector<1x4x256xf32>
    tpu.vector_store %arg12[%c0_33, %c0_34, %c0_35], %113 {strides = array<i32>} : memref<1x4x256xf32, #tpu.memory_space<vmem>>, vector<1x4x256xf32>,
    return
  }
  func.func @transform_0(%arg0: i32) -> (i32, i32, i32) {
    %c0_i32 = arith.constant 0 : i32
    %c0_i32_0 = arith.constant 0 : i32
    %c0_i32_1 = arith.constant 0 : i32
    return %arg0, %c0_i32, %c0_i32_0 : i32, i32, i32
  }
  func.func @transform_1(%arg0: i32) -> (i32, i32) {
    %c0_i32 = arith.constant 0 : i32
    %c0_i32_0 = arith.constant 0 : i32
    %c0_i32_1 = arith.constant 0 : i32
    return %c0_i32, %c0_i32_0 : i32, i32
  }
  func.func @transform_2(%arg0: i32) -> (i32, i32) {
    %c0_i32 = arith.constant 0 : i32
    %c0_i32_0 = arith.constant 0 : i32
    %c0_i32_1 = arith.constant 0 : i32
    return %c0_i32, %c0_i32_0 : i32, i32
  }
  func.func @transform_3(%arg0: i32) -> (i32, i32, i32) {
    %c0_i32 = arith.constant 0 : i32
    %c0_i32_0 = arith.constant 0 : i32
    %c0_i32_1 = arith.constant 0 : i32
    %c0_i32_2 = arith.constant 0 : i32
    return %c0_i32, %c0_i32_0, %c0_i32_1 : i32, i32, i32
  }
  func.func @transform_4(%arg0: i32) -> (i32, i32) {
    %c0_i32 = arith.constant 0 : i32
    %c0_i32_0 = arith.constant 0 : i32
    %c0_i32_1 = arith.constant 0 : i32
    return %c0_i32, %c0_i32_0 : i32, i32
  }
  func.func @transform_5(%arg0: i32) -> (i32, i32) {
    %c0_i32 = arith.constant 0 : i32
    %c0_i32_0 = arith.constant 0 : i32
    %c0_i32_1 = arith.constant 0 : i32
    return %c0_i32, %c0_i32_0 : i32, i32
  }
  func.func @transform_6(%arg0: i32) -> (i32, i32) {
    %c0_i32 = arith.constant 0 : i32
    %c0_i32_0 = arith.constant 0 : i32
    %c0_i32_1 = arith.constant 0 : i32
    return %c0_i32, %c0_i32_0 : i32, i32
  }
  func.func @transform_7(%arg0: i32) -> (i32, i32) {
    %c0_i32 = arith.constant 0 : i32
    %c0_i32_0 = arith.constant 0 : i32
    %c0_i32_1 = arith.constant 0 : i32
    return %c0_i32, %c0_i32_0 : i32, i32
  }
  func.func @transform_8(%arg0: i32) -> (i32, i32) {
    %c0_i32 = arith.constant 0 : i32
    %c0_i32_0 = arith.constant 0 : i32
    %c0_i32_1 = arith.constant 0 : i32
    return %c0_i32, %c0_i32_0 : i32, i32
  }
  func.func @transform_9(%arg0: i32) -> (i32, i32) {
    %c0_i32 = arith.constant 0 : i32
    %c0_i32_0 = arith.constant 0 : i32
    %c0_i32_1 = arith.constant 0 : i32
    return %c0_i32, %c0_i32_0 : i32, i32
  }
  func.func @transform_10(%arg0: i32) -> (i32, i32) {
    %c0_i32 = arith.constant 0 : i32
    %c0_i32_0 = arith.constant 0 : i32
    %c0_i32_1 = arith.constant 0 : i32
    return %c0_i32, %c0_i32_0 : i32, i32
  }
  func.func @transform_11(%arg0: i32) -> (i32, i32, i32) {
    %c0_i32 = arith.constant 0 : i32
    %c0_i32_0 = arith.constant 0 : i32
    %c0_i32_1 = arith.constant 0 : i32
    return %arg0, %c0_i32, %c0_i32_0 : i32, i32, i32
  }
}

</mosaic_0001>

<bundles_post_ra>
// kernel: tpu_custom_call.1
= control target key start
LH: loop header
LB: loop body
LE: loop exit
PB: predicated region body
PF: predicated region fallthrough
CT: control target
= control target key end

     0   :  { %16 = vsyncpa [#allocation3], 0  ;;  %s1788_s0 = inlined_call_operand.vmem [shape: f32[2,4,256], index: 0, kind: input, shape index: {}]   ;;  %s1789_s1 = inlined_call_operand.vmem [shape: f32[16,4], index: 1, kind: input, shape index: {}]   ;;  %s1790_s2 = inlined_call_operand.vmem [shape: f32[16,1], index: 2, kind: input, shape index: {}]   ;;  %s1791_s3 = inlined_call_operand.hbm [shape: f32[9,16,256], index: 3, kind: input, shape index: {}]   ;;  %s1792_s4 = inlined_call_operand.vmem [shape: f32[16,1], index: 4, kind: input, shape index: {}]   ;;  %s1793_s5 = inlined_call_operand.vmem [shape: f32[16,4], index: 5, kind: input, shape index: {}]   ;;  %s1794_s6 = inlined_call_operand.vmem [shape: f32[1,4], index: 6, kind: input, shape index: {}]   ;;  %s1795_s7 = inlined_call_operand.vmem [shape: f32[4,16], index: 7, kind: input, shape index: {}]   ;;  %s1796_s8 = inlined_call_operand.vmem [shape: f32[1,16], index: 8, kind: input, shape index: {}]   ;;  %s1797_s9 = inlined_call_operand.vmem [shape: f32[4,16], index: 9, kind: input, shape index: {}]   ;;  %s1798_s10 = inlined_call_operand.vmem [shape: f32[4,1], index: 10, kind: input, shape index: {}]   ;;  %s1799_s11 = inlined_call_operand.hbm [shape: f32[2,4,256], index: 11, kind: output, shape index: {}]  }
   0x1   :  { %17 = vsyncpa [#allocation4], 0 }
   0x2   :  { %19 = vsyncpa [#allocation4 + $0x1], 0  ;;  %s1405_s17 = smov 0   ;;  %s1407_s18 = smov 0  }
   0x3   :  { %s1409_s19 = smov 0   ;;  %s1411_s20 = smov 0  }
   0x4 LB: > { %s1426_s21 = sadd.s32 4294967295, %s1327_s20   ;;  %s1111_s22 = sadd.s32 4294967294, %s1327_s20   ;;  %s1327_s20 = sphi %s1411_s20, %s1817_s20   ;;  %s1323_s19 = sphi %s1409_s19, %s1816_s19   ;;  %s1319_s18 = sphi %s1407_s18, %s1815_s18   ;;  %s1315_s17 = sphi %s1405_s17, %s1814_s17  }
   0x5   : > { %s1430_s23 = sadd.s32 1, %s1327_s20   ;;  %s268_s24 = sadd.s32 1, %s1323_s19 }
   0x6   : > { %s265_s25 = ssub.s32 %s1327_s20, %s1430_s23  ;;  %p278_p0 = scmp.ne.s32.totalorder %s1323_s19, %s1319_s18 }
   0x7   : > { %p266_p1 = scmp.eq.s32.totalorder %s265_s25, 0  ;;  %p279_p2 = scmp.eq.s32.totalorder %s1426_s21, 1 }
   0x8   : > { %p284_p3 = scmp.ne.s32.totalorder %s1319_s18, %s1315_s17  ;;  %p285_p4 = scmp.eq.s32.totalorder %s1111_s22, 1 }
   0x9   : > { %s1441_s26 = scalar_select %p266_p1, %s1323_s19, %s268_s24  }
   0xa   : > { %p1443_p5 = por %p279_p2, %p278_p0  ;;  %p1447_p6 = por %p285_p4, %p284_p3 }
   0xb   : > { %1803 = sst [smem:[#allocation8_spill]] %s1441_s26  ;;  %p1112_p7 = scmp.ge.s32.totalorder %s1327_s20, 1 }
   0xc   : > { %s1804_s27 = scalar_select %p1443_p5, 1, 0 }
   0xd   : > { %s1805_s28 = scalar_select %p1447_p6, 1, 0 }
   0xe   : > { %p292_p8 = scmp.lt.s32.totalorder %s1327_s20, 3  ;;  %p1800_p9 = scmp.eq.s32.totalorder %s1426_s21, 0 }
   0xf   : > { %s1329_s30 = smov [#allocation2]   ;;  %s1233_s16 = scalar_lea.hbm %s1791_s3, 4608 }
  0x10   : > { %p1454_p10 = pnand %p1112_p7, %p292_p8  ;;  %s310_s12 = sshll.u32 %s1329_s30, 4  ;;  %s311_s12 = int_to_ptr.vmem [resolvable:$true] %s310_s12 }
  0x11   : > { %p1234_p13 = scmp.ne.s32.totalorder %s1791_s3, %s1233_s16  ;;  %p1240_p3 = scmp.lt.u32.totalorder %s1233_s16, %s1791_s3 }
  0x12   : > { %s1806_s29 = scalar_select %p1454_p10, 1, 0 }
  0x13   : > { %p1166_p11 = pneg %p1454_p10 }
  0x15   : > { %p1462_p12 = pnand %p1800_p9, %p1166_p11 }
  0x17   : > { %p1235_p0 = pneg %p1462_p12 }
  0x19   : > { %p1236_p1 = pnand %p1235_p0, %p1234_p13 }
  0x1b   : > { %p1237_p2 = pneg %p1236_p1 }
  0x1d   : > { %p1242_p4 = pnand %p1240_p3, %p1237_p2 }
  0x1f   : > { %1245 = shalt.err (!%p1242_p4)
}
  0x20   : > { %s1246_s26 = scalar_lea.vmem %s311_s12, 4608  ;;  %p1254_p9 = scmp.lt.s32.totalorder %s311_s12, %s311_s12 }
  0x21   : > { %p1247_p7 = scmp.ne.s32.totalorder %s311_s12, %s1246_s26  ;;  %p1255_p6 = scmp.lt.s32.totalorder %s1246_s26, %s1246_s26 }
  0x23   : > { %p1249_p8 = pnand %p1247_p7, %p1235_p0  ;;  %p1256_p5 = por %p1255_p6, %p1254_p9 }
  0x25   : > { %p1250_p11 = pneg %p1249_p8 }
  0x27   : > { %p1257_p10 = pnand %p1256_p5, %p1250_p11 }
  0x29   : > { %1260 = shalt.err (!%p1257_p10)
}
  0x2a   : > { %s1330_s14 = smov 256   ;;  %s1331_s15 = smov 16  }
  0x2b   : > { %1169 = dma.hbm_to_vmem [thread:$0]  (!%p1462_p12), %s1791_s3, 4608, %s311_s12, [#allocation3], %s1330_s14, %s1330_s14, %s1331_s15  }
  0x2c   : > { %p1808_p13 = scmp.ne.s32.totalorder %s1806_s29, 0 }
  0x2d   : > { %p1809_p1 = scmp.eq.s32.totalorder (!%p1808_p13), %s1426_s21, 0 }
  0x2e   : > { %355 = sbr.rel (%p1808_p13) target bundleno = 1451 (0x5ab), region = 64 }
  0x35   : > { %1306 = dma.done.wait (%p1809_p1), [#allocation3], 4608   ;;  %p1810_p0 = pmov %p1809_p1 }
  0x36   : > { %p395_p5 = scmp.lt.s32.totalorder %s1426_s21, 1  ;;  %v1332_v0 = vmov 0.0   ;;  %v1333_v1 = vmov 0   ;;  %vm424_vm0 = vcmask 1043456   ;;  %v403_v4 = vld [vmem:[%s1790_s2] sm:$0xff]  ;;  %vm417_vm1 = vcmask 31744  }
  0x37   : > { %1308 = vsyncadd (%p1810_p0), [#allocation3], 4294962688  ;;  %493 = vmatprep.mubr.f32.mxu0 %v1332_v0  ;;  %1224 = vset.pattern.permute.xlu0 %v1333_v1  ;;  %v401_v5 = vld [vmem:[%s1789_s1] sm:$0xff]  ;;  %v717_v6 = vld [vmem:[%s1792_s4 + $0x8] sm:$0xff]  ;;  %s1334_s30 = smov 16   ;;  %s1335_s14 = smov 17   ;;  %v554_v36 = vlaneseq }
  0x38   : > { %s396_s26 = scalar_select %p395_p5, %s1426_s21, 1  ;;  %1225 = vset.pattern.permute.xlu1 %v1333_v1  ;;  %407 = vperm.xlu0 %1224, %v403_v4   ;;  %v404_v7 = vld [vmem:[%s1790_s2 + $0x8] sm:$0xff]  ;;  %v716_v9 = vld [vmem:[%s1792_s4] sm:$0xff]  ;;  %v524_v50 = vld [vmem:[#allocation2 + $0x90] sm:$0xff]  ;;  %vm1343_vm10 = vmmov 0   ;;  %vm755_vm11 = vcmask 130112  }
  0x39   : > { %725 = vperm.xlu1 %1225, %v717_v6   ;;  %v402_v8 = vld [vmem:[%s1789_s1 + $0x8] sm:$0xff]  ;;  %s1336_s15 = smov 15   ;;  %s1337_s22 = smov 1   ;;  %v1586_v39 = vand.u32 127, %v554_v36  ;;  %v506_v42 = vld [vmem:[#allocation2] sm:$0xff]  ;;  %v525_v51 = vld [vmem:[#allocation2 + $0x98] sm:$0xff]  ;;  %1145 = vmatprep.mubr.msk.f32.mxu1 %vm1343_vm10, %v1332_v0 }
  0x3a   : > { %s1134_s12 = sshll.u32 %s396_s26, 3  ;;  %s1338_s24 = smov 127   ;;  %v507_v43 = vld [vmem:[#allocation2 + $0x8] sm:$0xff]  ;;  %v522_v48 = vld [vmem:[#allocation2 + $0x80] sm:$0xff]  ;;  %vm757_vm12 = vcmask 130048  }
  0x3b   : > { %s399_s16 = scalar_lea.vmem %s1788_s0, %s1134_s12  ;;  %s1339_s26 = smov 113   ;;  %vm556_vm2 = vcmp.lt.s32.totalorder %v1586_v39, 17  ;;  %vm577_vm3 = vcmp.lt.s32.totalorder %v1586_v39, 16  ;;  %v523_v49 = vld [vmem:[#allocation2 + $0x88] sm:$0xff]  ;;  %vm598_vm4 = vcmp.lt.s32.totalorder %v1586_v39, 15  ;;  %v510_v54 = vld [vmem:[#allocation2 + $0x20] sm:$0xff] }
  0x3c   : > { %v1494_v2 = vld [vmem:[%s399_s16] sm:$0xff]  ;;  %412 = vperm.xlu0 %1224, %v404_v7   ;;  %s1340_s12 = smov 112   ;;  %s1341_s13 = smov 111   ;;  %v511_v55 = vld [vmem:[#allocation2 + $0x28] sm:$0xff]  ;;  %vm619_vm5 = vcmp.lt.s32.totalorder %v1586_v39, 1  ;;  %vm640_vm6 = vcmp.lt.s32.totalorder %v1586_v39, 127 }
  0x3d   : > { %v416_v3 = vcombine.high %v1494_v2, %v1494_v2  ;;  %v514_v63 = vld [vmem:[#allocation2 + $0x40] sm:$0xff]  ;;  %v515_v1 = vld [vmem:[#allocation2 + $0x48] sm:$0xff]  ;;  %vm661_vm7 = vcmp.lt.s32.totalorder %v1586_v39, 113  ;;  %vm682_vm8 = vcmp.lt.s32.totalorder %v1586_v39, 112  ;;  %vm703_vm9 = vcmp.lt.s32.totalorder %v1586_v39, 111  ;;  %p1811_p9 = scmp.ne.s32.totalorder %s1804_s27, 0 }
  0x3f   : > { %1120 = vmatprep.subr.msk.mxu0 %vm424_vm0, %v416_v3 }
  0x40   : > { %1121 = vmatpush1.msk.msra.mxu0 %vm424_vm0, %v1494_v2  ;;  %720 = vperm.xlu0 %1224, %v716_v9   ;;  %v509_v9 = vld [vmem:[#allocation2 + $0x18] sm:$0xff] }
  0x41   : > { %1122 = vmatmul.mubr.msk.f32.vlgmr.msra.gmra.mrb[0].mxu0 %vm417_vm1, %v401_v5 }
  0x42   : > { %499 = vmatprep.mubr.f32.mxu0 %v1332_v0 }
  0x45   : > { %1123 = vmatmul.mubr.msk.f32.gmra.mrb[2].mxu0 %vm417_vm1, %v402_v8  ;;  %v508_v8 = vld [vmem:[#allocation2 + $0x10] sm:$0xff] }
  0x46   : > { %1012 = vmatprep.mubr.f32.mxu0 %v1332_v0 }
  0xb7   : > { %v408_v10 = vpop.permute.xlu0 %407 }
  0xb8   : > { %v1561_v20 = vpop.permute.xlu1 %725 }
  0xbb   : > { %v413_v14 = vpop.permute.xlu0 %412 }
  0xbf   : > { %v1563_v21 = vpop.permute.xlu0 %720 }
 0x114   : > { %v495_v11 = vpop.f32.mrb[0].mxu0 }
 0x115   : > { %v1523_v12 = vadd.f32 %v495_v11, %v408_v10  ;;  %v497_v13 = vpop.f32.mrb[1].mxu0 }
 0x116   : > { %v498_v18 = vadd.f32 %v497_v13, %v408_v10 }
 0x117   : > { %569 = vrot.lane.b32.xlu0 %v1523_v12, %s1334_s30  ;;  %546 = vrot.lane.b32.xlu1 %v1523_v12, %s1335_s14  ;;  %v542_v59 = vmul.f32 %v522_v48, %v1523_v12 }
 0x118   : > { %v501_v15 = vpop.f32.mrb[2].mxu0  ;;  %v543_v58 = vmul.f32 %v523_v49, %v498_v18  ;;  %v526_v49 = vld [vmem:[#allocation2 + $0xa0] sm:$0xff] }
 0x119   : > { %v1529_v16 = vadd.f32 %v501_v15, %v413_v14  ;;  %v503_v17 = vpop.f32.mrb[3].mxu0  ;;  %v519_v15 = vld [vmem:[#allocation2 + $0x68] sm:$0xff] }
 0x11a   : > { %v1549_v19 = vadd.f32 %v503_v17, %v413_v14  ;;  %v518_v14 = vld [vmem:[#allocation2 + $0x60] sm:$0xff] }
 0x11b   : > { %590 = vrot.lane.b32.xlu0 %v1523_v12, %s1336_s15  ;;  %548 = vrot.lane.b32.xlu1 %v1529_v16, %s1335_s14  ;;  %v544_v60 = vmul.f32 %v524_v50, %v1529_v16  ;;  %v527_v50 = vld [vmem:[#allocation2 + $0xa8] sm:$0xff] }
 0x11c   : > { %v545_v5 = vmul.f32 %v525_v51, %v1549_v19 }
 0x11f   : > { %611 = vrot.lane.b32.xlu0 %v1523_v12, %s1337_s22  ;;  %571 = vrot.lane.b32.xlu1 %v1529_v16, %s1334_s30 }
 0x123   : > { %632 = vrot.lane.b32.xlu0 %v1523_v12, %s1338_s24  ;;  %592 = vrot.lane.b32.xlu1 %v1529_v16, %s1336_s15 }
 0x127   : > { %653 = vrot.lane.b32.xlu0 %v1523_v12, %s1339_s26  ;;  %613 = vrot.lane.b32.xlu1 %v1529_v16, %s1337_s22 }
 0x12b   : > { %674 = vrot.lane.b32.xlu0 %v1523_v12, %s1340_s12  ;;  %634 = vrot.lane.b32.xlu1 %v1529_v16, %s1338_s24 }
 0x12f   : > { %695 = vrot.lane.b32.xlu0 %v1523_v12, %s1341_s13  ;;  %655 = vrot.lane.b32.xlu1 %v1529_v16, %s1339_s26 }
 0x133   : > { %550 = vrot.lane.b32.xlu0 %v498_v18, %s1335_s14  ;;  %676 = vrot.lane.b32.xlu1 %v1529_v16, %s1340_s12 }
 0x137   : > { %573 = vrot.lane.b32.xlu0 %v498_v18, %s1334_s30  ;;  %697 = vrot.lane.b32.xlu1 %v1529_v16, %s1341_s13 }
 0x13b   : > { %594 = vrot.lane.b32.xlu0 %v498_v18, %s1336_s15  ;;  %552 = vrot.lane.b32.xlu1 %v1549_v19, %s1335_s14 }
 0x13f   : > { %615 = vrot.lane.b32.xlu0 %v498_v18, %s1337_s22  ;;  %575 = vrot.lane.b32.xlu1 %v1549_v19, %s1334_s30  ;;  %s392_s30 = sand.u32 1, %s1319_s18  }
 0x140   : > { %s1117_s14 = sshll.u32 %s392_s30, 3  ;;  %s1026_s29 = scalar_lea.sflag [#allocation4], %s392_s30 }
 0x143   : > { %636 = vrot.lane.b32.xlu0 %v498_v18, %s1338_s24  ;;  %596 = vrot.lane.b32.xlu1 %v1549_v19, %s1336_s15  ;;  %s1135_s15 = sshll.u32 %s1426_s21, 7  ;;  %s1344_s21 = smov [#allocation5]  }
 0x144   : > { %s1265_s25 = sshll.u32 %s1344_s21, 4  ;;  %s1266_s25 = int_to_ptr.vmem [resolvable:$false] %s1265_s25 }
 0x147   : > { %657 = vrot.lane.b32.xlu0 %v498_v18, %s1339_s26  ;;  %617 = vrot.lane.b32.xlu1 %v1549_v19, %s1337_s22  ;;  %s394_s22 = scalar_lea.vmem [#allocation5], %s1117_s14  ;;  %s1267_s14 = scalar_lea.vmem %s1266_s25, 256 }
 0x14b   : > { %678 = vrot.lane.b32.xlu0 %v498_v18, %s1340_s12  ;;  %638 = vrot.lane.b32.xlu1 %v1549_v19, %s1338_s24  ;;  %s1040_s24 = sshll.u32 %s394_s22, 4  ;;  %s1748_s24 = int_to_ptr.vmem [resolvable:$true] %s1040_s24 }
 0x14c   : > { %s1261_s16 = scalar_lea.vmem %s1748_s24, 128  ;;  %p1268_p2 = scmp.lt.s32.totalorder %s1748_s24, %s1266_s25 }
 0x14d   : > { %p1262_p6 = scmp.ne.s32.totalorder %s1748_s24, %s1261_s16  ;;  %p1269_p3 = scmp.lt.s32.totalorder %s1267_s14, %s1261_s16 }
 0x14f   : > { %699 = vrot.lane.b32.xlu0 %v498_v18, %s1341_s13  ;;  %659 = vrot.lane.b32.xlu1 %v1549_v19, %s1339_s26  ;;  %p1263_p10 = pnand %p1262_p6, %p1811_p9  ;;  %p1270_p4 = por %p1269_p3, %p1268_p2 }
 0x151   : > { %p1264_p12 = pneg %p1263_p10 }
 0x153   : > { %680 = vrot.lane.b32.xlu1 %v1549_v19, %s1340_s12  ;;  %p1271_p7 = pnand %p1270_p4, %p1264_p12 }
 0x157   : > { %701 = vrot.lane.b32.xlu1 %v1549_v19, %s1341_s13  ;;  %s1746_s13 = scalar_lea.hbm %s1799_s11, %s1135_s15 }
 0x189   : > { %v570_v22 = vpop.permute.xlu0 %569  ;;  %v547_v23 = vpop.permute.xlu1 %546 }
 0x18d   : > { %v591_v24 = vpop.permute.xlu0 %590  ;;  %v549_v25 = vpop.permute.xlu1 %548 }
 0x191   : > { %v612_v26 = vpop.permute.xlu0 %611  ;;  %v1565_v27 = vpop.permute.xlu1 %571 }
 0x195   : > { %v1567_v28 = vpop.permute.xlu0 %632  ;;  %v1569_v29 = vpop.permute.xlu1 %592 }
 0x199   : > { %v1571_v30 = vpop.permute.xlu0 %653  ;;  %v1573_v31 = vpop.permute.xlu1 %613 }
 0x19d   : > { %v1575_v32 = vpop.permute.xlu0 %674  ;;  %v1577_v33 = vpop.permute.xlu1 %634 }
 0x1a1   : > { %v1579_v34 = vpop.permute.xlu0 %695  ;;  %v1581_v35 = vpop.permute.xlu1 %655 }
 0x1a5   : > { %v551_v37 = vpop.permute.xlu0 %550  ;;  %v1583_v38 = vpop.permute.xlu1 %676 }
 0x1a6   : > { %v557_v44 = vsel %vm556_vm2, %v547_v23, %v551_v37  ;;  %v559_v45 = vsel %vm556_vm2, %v551_v37, %v547_v23  ;;  %v513_v23 = vld [vmem:[#allocation2 + $0x38] sm:$0xff] }
 0x1a7   : > { %v561_v52 = vmul.f32 %v559_v45, %v506_v42  ;;  %v562_v53 = vmul.f32 %v557_v44, %v507_v43 }
 0x1a9   : > { %v574_v40 = vpop.permute.xlu0 %573  ;;  %v1588_v41 = vpop.permute.xlu1 %697  ;;  %v565_v12 = vadd.f32 %v561_v52, %v542_v59  ;;  %v566_v13 = vadd.f32 %v562_v53, %v543_v58 }
 0x1aa   : > { %v578_v56 = vsel %vm577_vm3, %v570_v22, %v574_v40  ;;  %v580_v57 = vsel %vm577_vm3, %v574_v40, %v570_v22  ;;  %v512_v22 = vld [vmem:[#allocation2 + $0x30] sm:$0xff] }
 0x1ab   : > { %v582_v6 = vmul.f32 %v580_v57, %v510_v54  ;;  %v583_v7 = vmul.f32 %v578_v56, %v511_v55  ;;  %v516_v54 = vld [vmem:[#allocation2 + $0x50] sm:$0xff]  ;;  %v517_v55 = vld [vmem:[#allocation2 + $0x58] sm:$0xff] }
 0x1ad   : > { %v595_v46 = vpop.permute.xlu0 %594  ;;  %v553_v47 = vpop.permute.xlu1 %552  ;;  %v587_v44 = vadd.f32 %v583_v7, %v566_v13 }
 0x1ae   : > { %v599_v3 = vsel %vm598_vm4, %v591_v24, %v595_v46  ;;  %v601_v4 = vsel %vm598_vm4, %v595_v46, %v591_v24  ;;  %v558_v10 = vsel %vm556_vm2, %v549_v25, %v553_v47  ;;  %v560_v11 = vsel %vm556_vm2, %v553_v47, %v549_v25 }
 0x1af   : > { %v603_v18 = vmul.f32 %v601_v4, %v514_v63  ;;  %v604_v19 = vmul.f32 %v599_v3, %v515_v1  ;;  %v563_v42 = vmul.f32 %v560_v11, %v508_v8  ;;  %v564_v43 = vmul.f32 %v558_v10, %v509_v9  ;;  %v530_v63 = vld [vmem:[#allocation2 + $0xc0] sm:$0xff]  ;;  %v531_v1 = vld [vmem:[#allocation2 + $0xc8] sm:$0xff] }
 0x1b1   : > { %v616_v61 = vpop.permute.xlu0 %615  ;;  %v576_v62 = vpop.permute.xlu1 %575  ;;  %v608_v53 = vadd.f32 %v604_v19, %v587_v44 }
 0x1b2   : > { %v620_v16 = vsel %vm619_vm5, %v612_v26, %v616_v61  ;;  %v622_v17 = vsel %vm619_vm5, %v616_v61, %v612_v26  ;;  %v579_v24 = vsel %vm577_vm3, %v1565_v27, %v576_v62  ;;  %v581_v25 = vsel %vm577_vm3, %v576_v62, %v1565_v27 }
 0x1b3   : > { %v586_v26 = vadd.f32 %v582_v6, %v565_v12  ;;  %v624_v45 = vmul.f32 %v622_v17, %v518_v14  ;;  %v625_v46 = vmul.f32 %v620_v16, %v519_v15  ;;  %v584_v47 = vmul.f32 %v581_v25, %v512_v22  ;;  %v520_v14 = vld [vmem:[#allocation2 + $0x70] sm:$0xff]  ;;  %v521_v15 = vld [vmem:[#allocation2 + $0x78] sm:$0xff] }
 0x1b4   : > { %v585_v48 = vmul.f32 %v579_v24, %v513_v23  ;;  %v567_v61 = vadd.f32 %v563_v42, %v544_v60  ;;  %v568_v62 = vadd.f32 %v564_v43, %v545_v5  ;;  %v534_v60 = vld [vmem:[#allocation2 + $0xe0] sm:$0xff]  ;;  %v535_v5 = vld [vmem:[#allocation2 + $0xe8] sm:$0xff]  ;;  %v528_v23 = vld [vmem:[#allocation2 + $0xb0] sm:$0xff] }
 0x1b5   : > { %v637_v37 = vpop.permute.xlu0 %636  ;;  %v597_v40 = vpop.permute.xlu1 %596  ;;  %v607_v52 = vadd.f32 %v603_v18, %v586_v26  ;;  %v629_v6 = vadd.f32 %v625_v46, %v608_v53  ;;  %v529_v24 = vld [vmem:[#allocation2 + $0xb8] sm:$0xff] }
 0x1b6   : > { %v641_v27 = vsel %vm640_vm6, %v1567_v28, %v637_v37  ;;  %v643_v51 = vsel %vm640_vm6, %v637_v37, %v1567_v28  ;;  %v600_v56 = vsel %vm598_vm4, %v1569_v29, %v597_v40  ;;  %v602_v57 = vsel %vm598_vm4, %v597_v40, %v1569_v29 }
 0x1b7   : > { %v628_v4 = vadd.f32 %v624_v45, %v607_v52  ;;  %v645_v7 = vmul.f32 %v641_v27, %v526_v49  ;;  %v646_v8 = vmul.f32 %v643_v51, %v527_v50  ;;  %v588_v9 = vadd.f32 %v584_v47, %v567_v61  ;;  %v538_v47 = vld [vmem:[#allocation2 + $0x100] sm:$0xff] }
 0x1b8   : > { %v589_v29 = vadd.f32 %v585_v48, %v568_v62  ;;  %v605_v10 = vmul.f32 %v602_v57, %v516_v54  ;;  %v606_v11 = vmul.f32 %v600_v56, %v517_v55  ;;  %v532_v54 = vld [vmem:[#allocation2 + $0xd0] sm:$0xff]  ;;  %v533_v55 = vld [vmem:[#allocation2 + $0xd8] sm:$0xff] }
 0x1b9   : > { %v658_v58 = vpop.permute.xlu0 %657  ;;  %v618_v59 = vpop.permute.xlu1 %617  ;;  %v649_v37 = vadd.f32 %v645_v7, %v628_v4  ;;  %v650_v40 = vadd.f32 %v646_v8, %v629_v6 }
 0x1ba   : > { %v662_v28 = vsel %vm661_vm7, %v1571_v30, %v658_v58  ;;  %v664_v3 = vsel %vm661_vm7, %v658_v58, %v1571_v30  ;;  %v621_v16 = vsel %vm619_vm5, %v1573_v31, %v618_v59  ;;  %v623_v30 = vsel %vm619_vm5, %v618_v59, %v1573_v31 }
 0x1bb   : > { %v666_v12 = vmul.f32 %v662_v28, %v530_v63  ;;  %v667_v13 = vmul.f32 %v664_v3, %v531_v1  ;;  %v609_v26 = vadd.f32 %v605_v10, %v588_v9  ;;  %v610_v44 = vadd.f32 %v606_v11, %v589_v29  ;;  %v536_v28 = vld [vmem:[#allocation2 + $0xf0] sm:$0xff]  ;;  %v537_v3 = vld [vmem:[#allocation2 + $0xf8] sm:$0xff] }
 0x1bc   : > { %v626_v45 = vmul.f32 %v623_v30, %v520_v14  ;;  %v627_v46 = vmul.f32 %v621_v16, %v521_v15  ;;  %v541_v14 = vld [vmem:[#allocation2 + $0x118] sm:$0xff] }
 0x1bd   : > { %v679_v17 = vpop.permute.xlu0 %678  ;;  %v639_v18 = vpop.permute.xlu1 %638  ;;  %v670_v48 = vadd.f32 %v666_v12, %v649_v37  ;;  %v671_v49 = vadd.f32 %v667_v13, %v650_v40  ;;  %v540_v13 = vld [vmem:[#allocation2 + $0x110] sm:$0xff] }
 0x1be   : > { %v683_v19 = vsel %vm682_vm8, %v1575_v32, %v679_v17  ;;  %v685_v22 = vsel %vm682_vm8, %v679_v17, %v1575_v32  ;;  %v642_v25 = vsel %vm640_vm6, %v1577_v33, %v639_v18  ;;  %v644_v31 = vsel %vm640_vm6, %v639_v18, %v1577_v33  ;;  %v539_v32 = vld [vmem:[#allocation2 + $0x108] sm:$0xff] }
 0x1bf   : > { %v687_v42 = vmul.f32 %v683_v19, %v534_v60  ;;  %v688_v43 = vmul.f32 %v685_v22, %v535_v5  ;;  %v647_v50 = vmul.f32 %v642_v25, %v528_v23  ;;  %v648_v27 = vmul.f32 %v644_v31, %v529_v24 }
 0x1c0   : > { %v630_v63 = vadd.f32 %v626_v45, %v609_v26  ;;  %v631_v1 = vadd.f32 %v627_v46, %v610_v44  ;;  %v1342_v26 = vmov 0.0|0.0   ;;  %v750_v44 = vadd.s32 4294967288, %v1586_v39 }
 0x1c1   : > { %v700_v51 = vpop.permute.xlu0 %699  ;;  %v660_v52 = vpop.permute.xlu1 %659  ;;  %v691_v58 = vadd.f32 %v687_v42, %v670_v48  ;;  %v692_v59 = vadd.f32 %v688_v43, %v671_v49  ;;  %v742_v42 = vld [vmem:[%s1793_s5 + $0x8] sm:$0xff]  ;;  %1153 = vmatprep.subr.bf16.mxu1 %v1342_v26 }
 0x1c2   : > { %v704_v33 = vsel %vm703_vm9, %v1579_v34, %v700_v51  ;;  %v706_v53 = vsel %vm703_vm9, %v700_v51, %v1579_v34  ;;  %v663_v56 = vsel %vm661_vm7, %v1581_v35, %v660_v52  ;;  %v665_v57 = vsel %vm661_vm7, %v660_v52, %v1581_v35 }
 0x1c3   : > { %v708_v61 = vmul.f32 %v704_v33, %v538_v47  ;;  %v709_v62 = vmul.f32 %v706_v53, %v539_v32  ;;  %v668_v6 = vmul.f32 %v663_v56, %v532_v54  ;;  %v669_v7 = vmul.f32 %v665_v57, %v533_v55 }
 0x1c4   : > { %v651_v9 = vadd.f32 %v647_v50, %v630_v63  ;;  %v652_v29 = vadd.f32 %v648_v27, %v631_v1  ;;  %v840_v63 = vld [vmem:[%s1796_s8] sm:$0x1] }
 0x1c5   : > { %v712_v4 = vadd.f32 %v708_v61, %v691_v58  ;;  %v713_v34 = vadd.f32 %v709_v62, %v692_v59  ;;  %v681_v8 = vpop.permute.xlu1 %680 }
 0x1c6   : > { %v684_v10 = vsel %vm682_vm8, %v1583_v38, %v681_v8  ;;  %v686_v35 = vsel %vm682_vm8, %v681_v8, %v1583_v38  ;;  %v672_v15 = vadd.f32 %v668_v6, %v651_v9  ;;  %v673_v16 = vadd.f32 %v669_v7, %v652_v29  ;;  %v939_v29 = vld [vmem:[%s1798_s10] sm:$0xf] }
 0x1c7   : > { %v689_v11 = vmul.f32 %v684_v10, %v536_v28  ;;  %v690_v60 = vmul.f32 %v686_v35, %v537_v3  ;;  %v1682_v5 = vadd.f32 %v1563_v21, %v712_v4  ;;  %v1685_v12 = vadd.f32 %v1563_v21, %v713_v34 }
 0x1c9   : > { %v702_v30 = vpop.permute.xlu1 %701  ;;  %v732_v17 = vadd.f32 %v1685_v12, %v1682_v5  ;;  %v693_v19 = vadd.f32 %v689_v11, %v672_v15  ;;  %v694_v22 = vadd.f32 %v690_v60, %v673_v16 }
 0x1ca   : > { %v705_v38 = vsel %vm703_vm9, %v1588_v41, %v702_v30  ;;  %v707_v18 = vsel %vm703_vm9, %v702_v30, %v1588_v41  ;;  %v741_v41 = vld [vmem:[%s1793_s5] sm:$0xff] }
 0x1cb   : > { %v710_v21 = vmul.f32 %v705_v38, %v540_v13  ;;  %v711_v23 = vmul.f32 %v707_v18, %v541_v14  ;;  %733 = vadd.xlane.f32.xlu0 %v732_v17  ;;  %v1154_v43 = vpack.c.bf16 %v742_v42, %v741_v41  ;;  %v938_v30 = vld [vmem:[%s1797_s9] sm:$0xf] }
 0x1cd   : > { %v714_v24 = vadd.f32 %v710_v21, %v693_v19  ;;  %v715_v25 = vadd.f32 %v711_v23, %v694_v22  ;;  %1155 = vmatpush3.bf16.msra.mxu1 %v1154_v43 }
 0x1ce   : > { %1148 = vmatprep.subr.mxu1 %v1332_v0 }
 0x1cf   : > { %v1696_v31 = vadd.f32 %v1561_v20, %v714_v24  ;;  %v1699_v37 = vadd.f32 %v1561_v20, %v715_v25  ;;  %v747_v20 = vshrl.u32 %v554_v36, 7  ;;  %v839_v36 = vld [vmem:[%s1795_s7] sm:$0xf] }
 0x1d1   : > { %v735_v40 = vadd.f32 %v1699_v37, %v1696_v31  ;;  %v748_v46 = vsub.s32 %v1586_v39, %v747_v20  ;;  %v753_v32 = vsub.s32 %v750_v44, %v747_v20  ;;  %v743_v39 = vld [vmem:[%s1794_s6] sm:$0x1]  ;;  %v925_v7 = vsub.s32 0, %v747_v20 }
 0x1d3   : > { %736 = vadd.xlane.f32.xlu1 %v735_v40 }
 0x258   : > { %v734_v45 = vpop.xlane.xlu0 %733 }
 0x259   : > { %v739_v47 = vmul.f32 0.00390625, %v734_v45 }
 0x25b   : > { %v749_v50 = vrot.slane %v739_v47, %v748_v46 }
 0x260   : > { %v737_v48 = vpop.xlane.xlu1 %736 }
 0x261   : > { %v740_v49 = vmul.f32 0.00390625, %v737_v48 }
 0x263   : > { %v754_v27 = vrot.slane %v740_v49, %v753_v32 }
 0x265   : > { %v756_v51 = vsel %vm755_vm11, %v754_v27, %v749_v50 }
 0x266   : > { %1146 = vmatmul.mubr.msk.f32.vlgmr.msra.gmra.mrb[0].mxu1 %vm757_vm12, %v756_v51 }
 0x267   : > { %1150 = vmatprep.mubr.msk.f32.mxu1 %vm1343_vm10, %v1332_v0  ;;  %1149 = vmatpush3.msk.msra.mxu1 %vm424_vm0, %v839_v36 }
 0x339   : > { %v826_v52 = vpop.f32.mrb[0].mxu1 }
 0x33a   : > { %v827_v33 = vadd.f32 %v826_v52, %v743_v39  ;;  %v1147_v53 = vpop.f32.mrb[1].mxu1 }
 0x33c   : > { %v831_v54 = vmul.f32 0.044715, %v827_v33  ;;  %v830_v59 = vmul.f32 0.5, %v827_v33 }
 0x33e   : > { %v832_v55 = vmul.f32 %v831_v54, %v827_v33 }
 0x340   : > { %v833_v56 = vmul.f32 %v832_v55, %v827_v33 }
 0x342   : > { %v834_v57 = vadd.f32 %v833_v56, %v827_v33 }
 0x344   : > { %v835_v58 = vmul.f32 0.7978846, %v834_v57 }
 0x346   : > { %1227 = vtanh.f32 %v835_v58 }
 0x350   : > { %v1228_v0 = vpop.eup %1227 }
 0x351   : > { %v837_v61 = vadd.f32 1.0, %v1228_v0 }
 0x353   : > { %v838_v62 = vmul.f32 %v837_v61, %v830_v59 }
 0x355   : > { %1151 = vmatmul.mubr.msk.f32.vlgmr.msra.gmra.mrb[2].mxu1 %vm417_vm1, %v838_v62 }
 0x428   : > { %v913_v1 = vpop.f32.mrb[2].mxu1 }
 0x429   : > { %v914_v28 = vadd.f32 %v913_v1, %v840_v63  ;;  %v1152_v3 = vpop.f32.mrb[3].mxu1 }
 0x42b   : > { %v1127_v4 = vmul.f32 -1.442695, %v914_v28 }
 0x42d   : > { %1229 = vpow2.f32 %v1127_v4 }
 0x437   : > { %v1230_v34 = vpop.eup %1229 }
 0x438   : > { %v920_v6 = vadd.f32 1.0, %v1230_v34 }
 0x43a   : > { %1231 = vrcp.f32 %v920_v6 }
 0x444   : > { %v1232_v8 = vpop.eup %1231 }
 0x445   : > { %v926_v9 = vrot.slane %v1232_v8, %v925_v7 }
 0x447   : > { %932 = vbcast.lane.b32.xlu1 %v926_v9, 264  ;;  %928 = vbcast.lane.b32.xlu0 %v926_v9, 256 }
 0x44b   : > { %942 = vperm.xlu0 %1224, %v939_v29  }
 0x4b9   : > { %v933_v10 = vpop.permute.xlu1 %932  ;;  %v929_v35 = vpop.permute.xlu0 %928 }
 0x4ba   : > { %v936_v11 = vmul.f32 %v933_v10, %v1696_v31  ;;  %v937_v60 = vmul.f32 %v933_v10, %v1699_v37  ;;  %v934_v13 = vmul.f32 %v929_v35, %v1682_v5  ;;  %v935_v14 = vmul.f32 %v929_v35, %v1685_v12 }
 0x4bc   : > { %v1156_v15 = vpack.c.bf16 %v937_v60, %v935_v14  ;;  %v1158_v16 = vpack.c.bf16 %v936_v11, %v934_v13 }
 0x4be   : > { %1157 = vmatprep.subr.bf16.mxu0 %v1156_v15 }
 0x4bf   : > { %1159 = vmatpush1.bf16.msra.mxu0 %v1158_v16 }
 0x4c2   : > { %1128 = vmatmul.mubr.msk.f32.vlgmr.msra.gmra.mrb[4].mxu0 %vm757_vm12, %v938_v30 }
 0x4ca   : > { %v943_v17 = vpop.permute.xlu0 %942 }
 0x595   : > { %v1014_v38 = vpop.f32.mrb[4].mxu0 }
 0x596   : > { %v1015_v18 = vadd.f32 %v1014_v38, %v943_v17  ;;  %v1016_v19 = vpop.f32.mrb[5].mxu0 }
 0x597   : > { %v1017_v5 = vadd.f32 %v1016_v19, %v943_v17 }
 0x599   : > { %v1021_v12 = vcombine.low %v1015_v18, %v1017_v5 }
 0x59b   : > { %v1023_v22 = vadd.f32 %v1021_v12, %v1494_v2 }
 0x59d   : > { %1024 = vst [vmem:[%s394_s22] sm:$0xff] %v1023_v22 }
 0x59e   : > { %1274 = shalt.err (!%p1271_p7)
}
 0x59f   : > { %s1275_s30 = scalar_lea.hbm %s1746_s13, 128  ;;  %s1279_s26 = scalar_lea.hbm %s1799_s11, 256 }
 0x5a0   : > { %p1276_p8 = scmp.ne.s32.totalorder %s1746_s13, %s1275_s30  ;;  %p1280_p1 = scmp.lt.u32.totalorder %s1746_s13, %s1799_s11 }
 0x5a1   : > { %p1281_p0 = scmp.lt.u32.totalorder %s1279_s26, %s1275_s30  ;;  %p1283_p6 = scmp.lt.u32.totalorder %s1275_s30, %s1746_s13 }
 0x5a2   : > { %p1277_p11 = pnand %p1276_p8, %p1811_p9 }
 0x5a3   : > { %p1282_p5 = por %p1281_p0, %p1280_p1 }
 0x5a4   : > { %p1278_p13 = pneg %p1277_p11 }
 0x5a5   : > { %p1284_p10 = por %p1283_p6, %p1282_p5 }
 0x5a7   : > { %p1285_p12 = pnand %p1284_p10, %p1278_p13 }
 0x5a9   : > { %1288 = shalt.err (!%p1285_p12)
}
 0x5aa   : > { %1164 = dma.vmem_to_hbm [thread:$0]  (%p1811_p9), %s1748_s24, 128, %s1746_s13, %s1026_s29  }
 0x5ab PF: > { %p1176_p2 = scmp.ge.s32.totalorder %s1327_s20, 2  ;;  %s1052_s16 = sand.u32 1, %s1315_s17  }
 0x5ac   : > { %p1812_p3 = scmp.ne.s32.totalorder %s1805_s28, 0  ;;  %s1053_s25 = scalar_lea.sflag [#allocation4], %s1052_s16 }
 0x5ae   : > { %p1171_p4 = pnand %p1176_p2, %p1812_p3 }
 0x5b0   : > { %1310 = dma.done.wait (!%p1171_p4), %s1053_s25, 128  }
 0x5b1   : > { %1312 = vsyncadd (!%p1171_p4), %s1053_s25, 4294967168  ;;  %s1813_s14 = sld [smem:[#allocation8_spill]]  ;;  %p22_p7 = scmp.ge.s32.totalorder %s1430_s23, 4  }
 0x5b2   : > { %s1814_s17 = smov %s1319_s18  ;;  %s1815_s18 = smov %s1323_s19 }
 0x5b3   : > { %s1817_s20 = smov %s1430_s23  ;;  %24 = sbr.rel (!%p22_p7) target bundleno = 4 (0x4), region = 104 }
 0x5b7   : > { %s1816_s19 = smov %s1813_s14 }
 0x5ba   :  { %1058 = vsyncpa [#allocation3], 1 }
 0x5bb   :  { %1060 = vsyncpa [#allocation3 + $0x1], 1 }
 0x5bc   :  { %1061 = vsyncpa [#allocation4], 1 }
 0x5bd   :  { %1063 = vsyncpa [#allocation4 + $0x1], 1 }

</bundles_post_ra>
